<compile_context>
chip_gen: v7x
topology: tpu7x:2x2x1
jax: 0.10.0
libtpu: 0.0.40
codegen_flags: <defaults>
</compile_context>

<pallas_src>
import math
import functools

import jax
import jax.numpy as jnp
from jax import lax
from jax.experimental import pallas as pl
from jax.experimental.pallas import tpu as pltpu


def _round_up(v, mult):
    return ((v + mult - 1) // mult) * mult


def _arcface_kernel(xn_ref, wn_ref, label_ref, o_ref, *,
                    s, cos_m, sin_m, th, mm, easy_margin, tn):
    j = pl.program_id(0)  # class-tile index (outer / slow grid axis)

    # cosine = xn @ wn.T without an explicit transpose: contract dim 1 of both.
    cosine = lax.dot_general(
        xn_ref[...], wn_ref[...],
        dimension_numbers=(((1,), (1,)), ((), ())),
        preferred_element_type=jnp.float32)                           # (tm, tn)

    # (1, tn) class-offset iota row; broadcast-compare against (tm, 1) labels.
    col = lax.broadcasted_iota(jnp.int32, (1, tn), 1) + j * tn        # (1, tn)
    mask = col == label_ref[...]                                      # (tm, tn)

    # Margin math only on the label column -> reduce to a (tm, 1) vector.
    cos_lbl = jnp.sum(jnp.where(mask, cosine, 0.0), axis=-1, keepdims=True)
    sine = jnp.sqrt(jnp.clip(1.0 - cos_lbl * cos_lbl, 0.0, 1.0))
    phi = cos_lbl * cos_m - sine * sin_m
    if easy_margin:
        phi = jnp.where(cos_lbl > 0.0, phi, cos_lbl)
    else:
        phi = jnp.where(cos_lbl > th, phi, cos_lbl - mm)

    # Single full-tile select + scale (phi broadcasts along the class axis;
    # at most one column per row is selected).
    o_ref[...] = (jnp.where(mask, phi, cosine) * s).astype(o_ref.dtype)


def arcface_forward(x, weight, label, *, s=30.0, m=0.5, easy_margin=False,
                    tm=256, tn=1024, mxu_dtype=jnp.bfloat16):
    """x: (B, D) f32, weight: (C, D) f32, label: (B,) int -> (B, C) f32 logits."""
    B, D = x.shape
    C, D2 = weight.shape
    assert D == D2

    cos_m = math.cos(m)
    sin_m = math.sin(m)
    th = math.cos(math.pi - m)
    mm = math.sin(math.pi - m) * m

    # Tile sizes: batch tiles 8-aligned, class tiles 128-aligned (lane-dense
    # output stores; MXU-friendly on v5e 4x128^2 and v6e/v7x 2x256^2).
    tm = _round_up(min(tm, _round_up(B, 8)), 8)
    tn = _round_up(min(tn, _round_up(C, 128)), 128)
    Bp = _round_up(B, tm)
    Cp = _round_up(C, tn)

    # --- Hoisted normalization (f32), then a single cast to the MXU dtype ---
    # Matches F.normalize(dim=1, eps=1e-12): v / max(||v||, 1e-12).
    xf = x.astype(jnp.float32)
    x_inv = lax.rsqrt(jnp.maximum(jnp.sum(xf * xf, axis=1, keepdims=True), 1e-24))
    xn = (xf * x_inv).astype(mxu_dtype)

    wf = weight.astype(jnp.float32)
    w_inv = lax.rsqrt(jnp.maximum(jnp.sum(wf * wf, axis=1, keepdims=True), 1e-24))
    wn = (wf * w_inv).astype(mxu_dtype)

    # Pad to tile multiples (padded rows/cols are sliced off at the end).
    xn_p = jnp.pad(xn, ((0, Bp - B), (0, 0)))
    wn_p = jnp.pad(wn, ((0, Cp - C), (0, 0)))
    label_p = jnp.pad(label.astype(jnp.int32), (0, Bp - B),
                      constant_values=-1).reshape(Bp, 1)

    # Grid: class/weight axis OUTER (slow), batch axis INNER (fast) ->
    # each weight tile is DMA'd from HBM exactly once and stays resident
    # across the inner batch sweep.
    grid = (Cp // tn, Bp // tm)

    kernel = functools.partial(
        _arcface_kernel, s=s, cos_m=cos_m, sin_m=sin_m, th=th, mm=mm,
        easy_margin=easy_margin, tn=tn)

    itemsize = jnp.dtype(mxu_dtype).itemsize
    # Double-buffered per-step VMEM footprint (x, w, labels, f32 out tile).
    step_bytes = 2 * (tm * D * itemsize + tn * D * itemsize
                      + tm * 4 + tm * tn * 4)
    # Leave headroom; never request the full 64 MiB physical VMEM of a v7x TC.
    vmem_limit = int(min(max(4 * step_bytes, 32 * 1024 * 1024),
                         48 * 1024 * 1024))

    cost = pl.CostEstimate(
        flops=2 * Bp * Cp * D,
        transcendentals=Bp * grid[0],
        bytes_accessed=(Cp * D + Bp * D * grid[0]) * itemsize
                       + Bp * Cp * 4 + Bp * 4 * grid[0])

    out_p = pl.pallas_call(
        kernel,
        out_shape=jax.ShapeDtypeStruct((Bp, Cp), jnp.float32),
        grid_spec=pltpu.PrefetchScalarGridSpec(
            num_scalar_prefetch=0,
            grid=grid,
            in_specs=[
                pl.BlockSpec((tm, D), lambda j, i: (i, 0)),  # xn (bf16)
                pl.BlockSpec((tn, D), lambda j, i: (j, 0)),  # wn (bf16, resident)
                pl.BlockSpec((tm, 1), lambda j, i: (i, 0)),  # labels
            ],
            out_specs=pl.BlockSpec((tm, tn), lambda j, i: (i, j)),
        ),
        compiler_params=pltpu.CompilerParams(
            dimension_semantics=("parallel", "parallel"),
            vmem_limit_bytes=vmem_limit),
        cost_estimate=cost,
    )(xn_p, wn_p, label_p)

    return out_p[:B, :C]


def _reference(x, weight, label, *, s=30.0, m=0.5, easy_margin=False):
    cos_m, sin_m = math.cos(m), math.sin(m)
    th = math.cos(math.pi - m)
    mm = math.sin(math.pi - m) * m
    xn = x / jnp.maximum(jnp.linalg.norm(x, axis=1, keepdims=True), 1e-12)
    wn = weight / jnp.maximum(jnp.linalg.norm(weight, axis=1, keepdims=True), 1e-12)
    cosine = xn @ wn.T
    sine = jnp.sqrt(jnp.clip(1.0 - cosine ** 2, 0.0, 1.0))
    phi = cosine * cos_m - sine * sin_m
    if easy_margin:
        phi = jnp.where(cosine > 0, phi, cosine)
    else:
        phi = jnp.where(cosine > th, phi, cosine - mm)
    one_hot = jax.nn.one_hot(label, cosine.shape[1], dtype=cosine.dtype)
    return (one_hot * phi + (1.0 - one_hot) * cosine) * s


if __name__ == "__main__":
    key = jax.random.PRNGKey(0)
    k_x, k_w, k_l = jax.random.split(key, 3)

    # --- Test 1: module-sized shapes, default bf16 MXU path --------------
    B, in_features, out_features = 8, 32, 16

    x = jax.random.normal(k_x, (B, in_features), dtype=jnp.float32)
    # xavier_uniform_ init for weight (out_features, in_features)
    bound = math.sqrt(6.0 / (in_features + out_features))
    weight = jax.random.uniform(
        k_w, (out_features, in_features), minval=-bound, maxval=bound,
        dtype=jnp.float32)
    label = jax.random.randint(k_l, (B,), 0, out_features, dtype=jnp.int32)

    out = arcface_forward(x, weight, label, s=30.0, m=0.5, easy_margin=False)
    out = jax.block_until_ready(out)
    ref = _reference(x, weight, label, s=30.0, m=0.5, easy_margin=False)
    assert out.shape == (B, out_features)
    # bf16 MXU inputs -> loosened tolerance vs the f32 reference.
    assert jnp.allclose(out, ref, atol=0.35, rtol=2e-2), "bf16 path mismatch"

    # --- Test 2: multi-tile grid (3 class tiles x 2 batch tiles), f32 MXU,
    # exercises the class-offset iota, grid order and padding logic. ------
    B2, D2, C2 = 16, 64, 300
    k_x2, k_w2, k_l2 = jax.random.split(jax.random.PRNGKey(1), 3)
    x2 = jax.random.normal(k_x2, (B2, D2), dtype=jnp.float32)
    bound2 = math.sqrt(6.0 / (D2 + C2))
    w2 = jax.random.uniform(k_w2, (C2, D2), minval=-bound2, maxval=bound2,
                            dtype=jnp.float32)
    l2 = jax.random.randint(k_l2, (B2,), 0, C2, dtype=jnp.int32)

    out2 = arcface_forward(x2, w2, l2, s=30.0, m=0.5, easy_margin=False,
                           tm=8, tn=128, mxu_dtype=jnp.float32)
    out2 = jax.block_until_ready(out2)
    ref2 = _reference(x2, w2, l2, s=30.0, m=0.5, easy_margin=False)
    assert out2.shape == (B2, C2)
    assert jnp.allclose(out2, ref2, atol=1e-4, rtol=1e-4), "f32 tiled mismatch"

    # --- Test 3: easy_margin branch --------------------------------------
    out3 = arcface_forward(x, weight, label, s=30.0, m=0.5, easy_margin=True)
    out3 = jax.block_until_ready(out3)
    ref3 = _reference(x, weight, label, s=30.0, m=0.5, easy_margin=True)
    assert jnp.allclose(out3, ref3, atol=0.35, rtol=2e-2), "easy_margin mismatch"

    print("KERNEL_OK")
</pallas_src>

<mosaic_0001>
module attributes {stable_mosaic.version = 11 : i64} {
  func.func @_arcface_kernel(%arg0: i32, %arg1: i32, %arg2: memref<8x32xbf16, #tpu.memory_space<vmem>>, %arg3: memref<128x32xbf16, #tpu.memory_space<vmem>>, %arg4: memref<8x1xi32, #tpu.memory_space<vmem>>, %arg5: memref<8x128xf32, #tpu.memory_space<vmem>>) attributes {dimension_semantics = [#tpu.dimension_semantics<parallel>, #tpu.dimension_semantics<parallel>], iteration_bounds = array<i64: 1, 1>, scalar_prefetch = 0 : i64, scratch_operands = 0 : i64, tpu.core_type = #tpu.core_type<tc>, window_params = [{transform_indices = @transform_0, window_bounds = array<i64: 8, 32>}, {transform_indices = @transform_1, window_bounds = array<i64: 128, 32>}, {transform_indices = @transform_2, window_bounds = array<i64: 8, 1>}, {transform_indices = @transform_3, window_bounds = array<i64: 8, 128>}]} {
    %c0 = arith.constant 0 : index
    %c0_0 = arith.constant 0 : index
    %0 = vector.load %arg2[%c0, %c0_0] : memref<8x32xbf16, #tpu.memory_space<vmem>>, vector<8x32xbf16>
    %c0_1 = arith.constant 0 : index
    %c0_2 = arith.constant 0 : index
    %1 = vector.load %arg3[%c0_1, %c0_2] : memref<128x32xbf16, #tpu.memory_space<vmem>>, vector<128x32xbf16>
    %cst = arith.constant dense<0.000000e+00> : vector<8x128xf32>
    %2 = tpu.matmul %0, %1, %cst {dimension_numbers = #tpu.dot_dimension_numbers<[1], [1], [0], [0], [0, 0, 1, 0], [], []>} : vector<8x32xbf16>, vector<128x32xbf16>, vector<8x128xf32> -> vector<8x128xf32>
    %3 = tpu.iota {dimensions = array<i32: 1>} : vector<1x128xi32>
    %c128_i32 = arith.constant 128 : i32
    %4 = arith.muli %arg0, %c128_i32 : i32
    %5 = vector.broadcast %4 : i32 to vector<1x128xi32>
    %6 = arith.addi %3, %5 : vector<1x128xi32>
    %c0_3 = arith.constant 0 : index
    %c0_4 = arith.constant 0 : index
    %7 = vector.load %arg4[%c0_3, %c0_4] : memref<8x1xi32, #tpu.memory_space<vmem>>, vector<8x1xi32>
    %8 = vector.broadcast %6 : vector<1x128xi32> to vector<8x128xi32>
    %9 = vector.broadcast %7 : vector<8x1xi32> to vector<8x128xi32>
    %10 = arith.cmpi eq, %8, %9 : vector<8x128xi32>
    %cst_5 = arith.constant 0.000000e+00 : f32
    %11 = vector.broadcast %cst_5 : f32 to vector<8x128xf32>
    %12 = arith.select %10, %2, %11 : vector<8x128xi1>, vector<8x128xf32>
    %cst_6 = arith.constant dense<0.000000e+00> : vector<8xf32>
    %13 = vector.multi_reduction <add>, %12, %cst_6 [1] : vector<8x128xf32> to vector<8xf32>
    %14 = vector.shape_cast %13 : vector<8xf32> to vector<8x1xf32>
    %15 = arith.mulf %14, %14 : vector<8x1xf32>
    %cst_7 = arith.constant 1.000000e+00 : f32
    %16 = vector.broadcast %cst_7 : f32 to vector<8x1xf32>
    %17 = arith.subf %16, %15 : vector<8x1xf32>
    %cst_8 = arith.constant 0.000000e+00 : f32
    %cst_9 = arith.constant 1.000000e+00 : f32
    %18 = vector.broadcast %cst_8 : f32 to vector<8x1xf32>
    %19 = arith.maximumf %18, %17 : vector<8x1xf32>
    %20 = vector.broadcast %cst_9 : f32 to vector<8x1xf32>
    %21 = arith.minimumf %20, %19 : vector<8x1xf32>
    %22 = math.sqrt %21 : vector<8x1xf32>
    %cst_10 = arith.constant 0.87758255 : f32
    %23 = vector.broadcast %cst_10 : f32 to vector<8x1xf32>
    %24 = arith.mulf %14, %23 : vector<8x1xf32>
    %cst_11 = arith.constant 0.47942555 : f32
    %25 = vector.broadcast %cst_11 : f32 to vector<8x1xf32>
    %26 = arith.mulf %22, %25 : vector<8x1xf32>
    %27 = arith.subf %24, %26 : vector<8x1xf32>
    %cst_12 = arith.constant -0.87758255 : f32
    %28 = vector.broadcast %cst_12 : f32 to vector<8x1xf32>
    %29 = arith.cmpf ogt, %14, %28 : vector<8x1xf32>
    %cst_13 = arith.constant 0.239712775 : f32
    %30 = vector.broadcast %cst_13 : f32 to vector<8x1xf32>
    %31 = arith.subf %14, %30 : vector<8x1xf32>
    %32 = arith.select %29, %27, %31 : vector<8x1xi1>, vector<8x1xf32>
    %33 = vector.shape_cast %32 : vector<8x1xf32> to vector<8x1xf32>
    %34 = vector.broadcast %33 : vector<8x1xf32> to vector<8x128xf32>
    %35 = arith.select %10, %34, %2 : vector<8x128xi1>, vector<8x128xf32>
    %cst_14 = arith.constant 3.000000e+01 : f32
    %36 = vector.broadcast %cst_14 : f32 to vector<8x128xf32>
    %37 = arith.mulf %35, %36 : vector<8x128xf32>
    %c0_15 = arith.constant 0 : index
    %c0_16 = arith.constant 0 : index
    %38 = vector.load %arg5[%c0_15, %c0_16] : memref<8x128xf32, #tpu.memory_space<vmem>>, vector<8x128xf32>
    tpu.vector_store %arg5[%c0_15, %c0_16], %37 {strides = array<i32>} : memref<8x128xf32, #tpu.memory_space<vmem>>, vector<8x128xf32>,
    return
  }
  func.func @transform_0(%arg0: i32, %arg1: i32) -> (i32, i32) {
    %c0_i32 = arith.constant 0 : i32
    %c0_i32_0 = arith.constant 0 : i32
    return %arg1, %c0_i32 : i32, i32
  }
  func.func @transform_1(%arg0: i32, %arg1: i32) -> (i32, i32) {
    %c0_i32 = arith.constant 0 : i32
    %c0_i32_0 = arith.constant 0 : i32
    return %arg0, %c0_i32 : i32, i32
  }
  func.func @transform_2(%arg0: i32, %arg1: i32) -> (i32, i32) {
    %c0_i32 = arith.constant 0 : i32
    %c0_i32_0 = arith.constant 0 : i32
    return %arg1, %c0_i32 : i32, i32
  }
  func.func @transform_3(%arg0: i32, %arg1: i32) -> (i32, i32) {
    %c0_i32 = arith.constant 0 : i32
    return %arg1, %arg0 : i32, i32
  }
}

</mosaic_0001>

<bundles_post_ra>
// kernel: tpu_custom_call.1
= control target key start
LH: loop header
LB: loop body
LE: loop exit
PB: predicated region body
PF: predicated region fallthrough
CT: control target
= control target key end

     0   :  { %v266_v1 = vmov 0.0   ;;  %vm73_vm0 = vcmask 261120   ;;  %vm267_vm1 = vmmov 0   ;;  %v268_v6 = vmov 0   ;;  %s343_s0 = inlined_call_operand.vmem [shape: bf16[8,32], index: 0, kind: input, shape index: {}]   ;;  %s344_s1 = inlined_call_operand.vmem [shape: bf16[128,32], index: 1, kind: input, shape index: {}]   ;;  %s345_s2 = inlined_call_operand.vmem [shape: s32[8,1], index: 2, kind: input, shape index: {}]   ;;  %s346_s3 = inlined_call_operand.hbm [shape: f32[8,128], index: 3, kind: output, shape index: {}]  }
   0x1   :  { %v232_v0 = vld [vmem:[%s344_s1] sm:$0xff]   ;;  %207 = vmatprep.subr.bf16.mxu0 %v266_v1  ;;  %v233_v3 = vld [vmem:[%s344_s1 + $0x8] sm:$0xff]   ;;  %223 = vmatprep.mubr.msk.bf16.mxu0 %vm267_vm1, %v266_v1 }
   0x2   :  { %v78_v2 = vsel %vm73_vm0, %v232_v0, 0  ;;  %v81_v4 = vsel %vm73_vm0, %v233_v3, 0  ;;  %v146_v5 = vld [vmem:[%s345_s2] sm:$0xff]  ;;  %231 = vset.pattern.permute.xlu0 %v268_v6 }
   0x3   :  { %208 = vmatpush3.bf16.xpose.msra.mxu0 %v78_v2 }
   0x4   :  { %209 = vmatprep.subr.bf16.mxu0 %v266_v1 }
   0x5   :  { %8 = vsyncpa [#allocation3], 0  ;;  %148 = vperm.xlu0 %231, %v146_v5   ;;  %v234_v7 = vld [vmem:[%s344_s1 + $0x10] sm:$0xff]   ;;  %v235_v9 = vld [vmem:[%s344_s1 + $0x18] sm:$0xff]   ;;  %v141_v20 = vlaneseq }
   0x6   :  { %v84_v8 = vsel %vm73_vm0, %v234_v7, 0  ;;  %v87_v10 = vsel %vm73_vm0, %v235_v9, 0  ;;  %v236_v11 = vld [vmem:[%s344_s1 + $0x20] sm:$0xff]   ;;  %v237_v13 = vld [vmem:[%s344_s1 + $0x28] sm:$0xff]   ;;  %v238_v15 = vld [vmem:[%s344_s1 + $0x30] sm:$0xff]  }
   0x7   :  { %v90_v12 = vsel %vm73_vm0, %v236_v11, 0  ;;  %v93_v14 = vsel %vm73_vm0, %v237_v13, 0  ;;  %v96_v16 = vsel %vm73_vm0, %v238_v15, 0  ;;  %v239_v17 = vld [vmem:[%s344_s1 + $0x38] sm:$0xff]   ;;  %v16_v19 = vld [vmem:[%s343_s0] sm:$0xf] }
   0x8   :  { %v99_v18 = vsel %vm73_vm0, %v239_v17, 0  ;;  %v142_v21 = vand.u32 127, %v141_v20  ;;  %s269_s0 = smov [#allocation2]  }
   0x9   :  { %s180_s1 = sshll.u32 %s269_s0, 4  ;;  %s181_s1 = int_to_ptr.vmem [resolvable:$true] %s180_s1 }
   0xa   :  { %s242_s4 = scalar_lea.vmem %s181_s1, 128  ;;  %p247_p1 = scmp.lt.s32.totalorder %s181_s1, %s181_s1 }
   0xb   :  { %210 = vmatpush3.bf16.xpose.msra.mxu0 %v81_v4  ;;  %p243_p0 = scmp.ne.s32.totalorder %s181_s1, %s242_s4  ;;  %p248_p2 = scmp.lt.s32.totalorder %s242_s4, %s242_s4 }
   0xc   :  { %211 = vmatprep.subr.bf16.mxu0 %v266_v1 }
   0xd   :  { %p249_p3 = por %p248_p2, %p247_p1 }
   0xf   :  { %p250_p4 = pnand %p249_p3, %p243_p0 }
  0x13   :  { %212 = vmatpush3.bf16.xpose.msra.mxu0 %v84_v8 }
  0x14   :  { %213 = vmatprep.subr.bf16.mxu0 %v266_v1 }
  0x1b   :  { %214 = vmatpush3.bf16.xpose.msra.mxu0 %v87_v10 }
  0x1c   :  { %215 = vmatprep.subr.bf16.mxu0 %v266_v1 }
  0x23   :  { %216 = vmatpush3.bf16.xpose.msra.mxu0 %v90_v12 }
  0x24   :  { %217 = vmatprep.subr.bf16.mxu0 %v266_v1 }
  0x2b   :  { %218 = vmatpush3.bf16.xpose.msra.mxu0 %v93_v14 }
  0x2c   :  { %219 = vmatprep.subr.bf16.mxu0 %v266_v1 }
  0x33   :  { %220 = vmatpush3.bf16.xpose.msra.mxu0 %v96_v16 }
  0x34   :  { %221 = vmatprep.subr.bf16.mxu0 %v266_v1 }
  0x3b   :  { %222 = vmatpush3.bf16.xpose.msra.mxu0 %v99_v18 }
  0x42   :  { %224 = vmatmul.mubr.msk.bf16.vlgmr.msra.gmra.mrb[0].mxu0 %vm73_vm0, %v16_v19 }
  0x84   :  { %v149_v22 = vpop.permute.xlu0 %148 }
  0x85   :  { %vm150_vm2 = vcmp.eq.s32.totalorder %v142_v21, %v149_v22 }
 0x115   :  { %v135_v23 = vpop.f32.mrb[0].mxu0 }
 0x116   :  { %v225_v24 = vpop.f32.mrb[1].mxu0  ;;  %v151_v25 = vsel %vm150_vm2, %v135_v23, 0.0 }
 0x117   :  { %152 = vadd.xlane.f32.xlu0 %v151_v25  ;;  %v138_v26 = vpop.f32.mrb[2].mxu0 }
 0x118   :  { %v226_v27 = vpop.f32.mrb[3].mxu0 }
 0x1a4   :  { %v153_v28 = vpop.xlane.xlu0 %152 }
 0x1a5   :  { %v154_v29 = vmul.f32 %v153_v28, %v153_v28  ;;  %v165_v38 = vmul.f32 0.87758255, %v153_v28  ;;  %v197_v41 = vadd.f32 -0.23971277, %v153_v28  ;;  %vm168_vm5 = vcmp.gt.f32.partialorder %v153_v28, -0.87758255 }
 0x1a7   :  { %v155_v30 = vsub.f32 1.0, %v154_v29 }
 0x1a9   :  { %v156_v31 = vmax.f32 %v155_v30, 0.0 }
 0x1ab   :  { %v157_v32 = vmin.f32 %v156_v31, 1.0 }
 0x1ad   :  { %240 = vrsqrt.f32 %v157_v32  ;;  %vm160_vm3 = vcmp.eq.f32.partialorder %v157_v32, inf  ;;  %v163_v35 = vand.u32 2147483648, %v157_v32  ;;  %vm162_vm4 = vcmp.eq.f32.partialorder %v157_v32, 0.0 }
 0x1b7   :  { %v241_v33 = vpop.eup %240 }
 0x1b8   :  { %v159_v34 = vmul.f32 %v241_v33, %v157_v32 }
 0x1ba   :  { %v161_v36 = vsel %vm160_vm3, %v157_v32, %v159_v34 }
 0x1bb   :  { %v164_v37 = vsel %vm162_vm4, %v163_v35, %v161_v36 }
 0x1bc   :  { %v166_v39 = vmul.f32 0.47942555, %v164_v37 }
 0x1be   :  { %v167_v40 = vsub.f32 %v165_v38, %v166_v39 }
 0x1c0   :  { %v170_v42 = vsel %vm168_vm5, %v167_v40, %v197_v41 }
 0x1c1   :  { %v171_v43 = vsel %vm150_vm2, %v170_v42, %v135_v23 }
 0x1c2   :  { %v172_v44 = vmul.f32 30.0, %v171_v43 }
 0x1c4   :  { %173 = vst [vmem:[#allocation2] sm:$0xff] %v172_v44 }
 0x1c5   :  { %253 = shalt.err (!%p250_p4)
}
 0x1c6   :  { %s254_s7 = scalar_lea.hbm %s346_s3, 128 }
 0x1c7   :  { %p255_p5 = scmp.ne.s32.totalorder %s346_s3, %s254_s7  ;;  %p258_p6 = scmp.lt.u32.totalorder %s254_s7, %s346_s3 }
 0x1c9   :  { %p260_p7 = pnand %p258_p6, %p255_p5 }
 0x1cb   :  { %263 = shalt.err (!%p260_p7)
}
 0x1cc   :  { %183 = dma.vmem_to_hbm [thread:$0]  %s181_s1, 128, %s346_s3, [#allocation3]  }
 0x1cd   :  { %264 = dma.done.wait [#allocation3], 128  }
 0x1ce   :  { %265 = vsyncadd [#allocation3], 4294967168 }
 0x1cf   :  { %187 = vsyncpa [#allocation3], 1 }

</bundles_post_ra>
